<compile_context>
chip_gen: v7x
topology: tpu7x:2x2x1
jax: 0.10.0
libtpu: 0.0.40
codegen_flags: <defaults>
</compile_context>

<pallas_src>
import functools

import jax
import jax.numpy as jnp
import numpy as np
from jax.experimental import pallas as pl
from jax.experimental.pallas import tpu as pltpu


def _round_up(x, m):
    return (x + m - 1) // m * m


# ----------------------------- Pallas kernel -----------------------------
def primary_caps_kernel(p_ref, w_ref, b_ref, g_ref, o_ref, *, tile_k):
    # p_ref : (TM, TK)      bf16 im2col patch tile (K-step kk of row tile i)
    # w_ref : (K_pad, Cp)   bf16 full conv weight, VMEM-resident (const index)
    # b_ref : (1,  Cp)      f32  bias (zero in padded lanes)
    # g_ref : (Cp, Cp)      bf16 block-diagonal capsule grouping matrix (0/1)
    # o_ref : (TM, Cp)      f32  output block; doubles as the f32 accumulator
    #                            (its block index is constant along the K axis)
    kk = pl.program_id(1)

    @pl.when(kk == 0)
    def _():
        o_ref[...] = jnp.zeros_like(o_ref)

    k0 = pl.multiple_of(kk * tile_k, 128)
    o_ref[...] += jnp.dot(p_ref[...], w_ref[pl.ds(k0, tile_k), :],
                          preferred_element_type=jnp.float32)

    @pl.when(kk == pl.num_programs(1) - 1)
    def _():
        conv = o_ref[...] + b_ref[...]
        # Per-capsule squared norm, broadcast to every component of the capsule
        # via a block-diagonal grouping matmul (no in-kernel reshape).  g is
        # exactly representable in bf16, so only conv^2 is rounded (<0.4% rel).
        sq = jnp.dot((conv * conv).astype(jnp.bfloat16), g_ref[...],
                     preferred_element_type=jnp.float32)
        # squash: (sq/(1+sq)) * conv / (sqrt(sq)+1e-8)
        #       = conv * sq * 1/((1+sq)*(sqrt(sq)+1e-8))   -> single reciprocal
        inv = pl.reciprocal((1.0 + sq) * (jnp.sqrt(sq) + 1e-8), approx=False)
        o_ref[...] = conv * sq * inv


# ------------------------------ JAX wrapper -------------------------------
def im2col(x, k, s):
    """x: (N, C, H, W) -> patches (N*Ho*Wo, C*k*k), feature order (C, kh, kw)."""
    N, C, H, W = x.shape
    Ho = (H - k) // s + 1
    Wo = (W - k) // s + 1
    idx_h = (jnp.arange(Ho) * s)[:, None] + jnp.arange(k)[None, :]   # (Ho, k)
    idx_w = (jnp.arange(Wo) * s)[:, None] + jnp.arange(k)[None, :]   # (Wo, k)
    patches = x[:, :, idx_h[:, None, :, None], idx_w[None, :, None, :]]
    patches = patches.transpose(0, 2, 3, 1, 4, 5)                    # (N,Ho,Wo,C,k,k)
    return patches.reshape(N * Ho * Wo, C * k * k), Ho, Wo


def primary_caps_forward(x, weight, bias, *, num_conv_units, caps_dim,
                         kernel_size, stride, tile_m=256, tile_k=2304,
                         compute_dtype=jnp.bfloat16):
    """x: (N, C_in, H, W) NCHW; weight: (C_out, C_in, k, k); bias: (C_out,)."""
    N = x.shape[0]
    C_out = num_conv_units * caps_dim
    k, s = kernel_size, stride

    # im2col chain runs entirely in the (bf16) compute dtype.
    patches, Ho, Wo = im2col(x.astype(compute_dtype), k, s)          # (M, K)
    M, K = patches.shape

    # --- tile / pad sizes -----------------------------------------------------
    tile_k = max(128, (min(tile_k, _round_up(K, 128)) // 128) * 128)  # 128-mult
    m_aligned = _round_up(M, 16)          # bf16 native sublane tile is (16,128)
    tile_m = min(tile_m, m_aligned)
    if m_aligned >= 256 and m_aligned < 2 * tile_m:
        # v7x has 2 TensorCores: keep >=2 blocks on the parallel M axis.
        tile_m = _round_up((m_aligned + 1) // 2, 16)
    M_pad = _round_up(M, tile_m)
    K_pad = _round_up(K, tile_k)
    C_pad = _round_up(C_out, 128)         # lane-dense (unmasked) output stores

    # --- operands (zero padding keeps the GEMM / squash exact) -----------------
    patches = jnp.pad(patches, ((0, M_pad - M), (0, K_pad - K)))

    w_mat = weight.reshape(C_out, K).T.astype(compute_dtype)         # (K, C_out)
    w_mat = jnp.pad(w_mat, ((0, K_pad - K), (0, C_pad - C_out)))

    b_mat = jnp.pad(bias.astype(jnp.float32).reshape(1, C_out),
                    ((0, 0), (0, C_pad - C_out)))

    # Block-diagonal grouping matrix: G[i, j] = 1 iff conv channels i, j belong
    # to the same capsule; zero in the padded block so padded lanes never
    # contaminate sq.  Entries are 0/1 -> exact in bf16.
    grp = jnp.arange(C_out) // caps_dim
    g_small = (grp[:, None] == grp[None, :]).astype(jnp.bfloat16)
    g_mat = jnp.zeros((C_pad, C_pad), jnp.bfloat16).at[:C_out, :C_out].set(g_small)

    grid = (M_pad // tile_m, K_pad // tile_k)

    cost = pl.CostEstimate(
        flops=2 * M_pad * K_pad * C_pad + 2 * M_pad * C_pad * C_pad,
        transcendentals=2 * M_pad * C_pad,
        bytes_accessed=(patches.size * patches.dtype.itemsize
                        + w_mat.size * w_mat.dtype.itemsize
                        + b_mat.size * 4
                        + g_mat.size * g_mat.dtype.itemsize
                        + M_pad * C_pad * 4))

    out = pl.pallas_call(
        functools.partial(primary_caps_kernel, tile_k=tile_k),
        out_shape=jax.ShapeDtypeStruct((M_pad, C_pad), jnp.float32),
        grid_spec=pltpu.PrefetchScalarGridSpec(
            num_scalar_prefetch=0,
            grid=grid,
            in_specs=[
                # K-tiled patch stream.
                pl.BlockSpec((tile_m, tile_k), lambda i, kk: (i, kk)),
                # Full weight with a constant block index: fetched once and
                # kept resident in VMEM instead of re-streamed per M tile.
                pl.BlockSpec((K_pad, C_pad), lambda i, kk: (0, 0)),
                pl.BlockSpec((1, C_pad), lambda i, kk: (0, 0)),
                pl.BlockSpec((C_pad, C_pad), lambda i, kk: (0, 0)),
            ],
            out_specs=pl.BlockSpec((tile_m, C_pad), lambda i, kk: (i, 0)),
        ),
        compiler_params=pltpu.CompilerParams(
            dimension_semantics=("parallel", "arbitrary"),
            vmem_limit_bytes=48 * 1024 * 1024),
        cost_estimate=cost,
    )(patches, w_mat, b_mat, g_mat)

    out = out[:M, :C_out]                                # (N*Ho*Wo, U*D)
    # conv channel c = u*D + d  ->  PyTorch: view(N,U,D,H,W).permute(0,1,3,4,2).view(N,-1,D)
    out = out.reshape(N, Ho, Wo, num_conv_units, caps_dim)
    out = out.transpose(0, 3, 1, 2, 4)                   # (N, U, Ho, Wo, D)
    out = out.reshape(N, num_conv_units * Ho * Wo, caps_dim)
    return out


# ------------------------------ Reference ---------------------------------
def primary_caps_reference(x, weight, bias, *, num_conv_units, caps_dim,
                           kernel_size, stride, compute_dtype=jnp.float32):
    """Reference forward.  With compute_dtype=bf16 the conv inputs are rounded
    to bf16 first (the kernel's accuracy contract); the math stays f32."""
    xq = x.astype(compute_dtype).astype(jnp.float32)
    wq = weight.astype(compute_dtype).astype(jnp.float32)
    s = stride
    conv = jax.lax.conv_general_dilated(
        xq, wq, window_strides=(s, s), padding="VALID",
        dimension_numbers=("NCHW", "OIHW", "NCHW"),
        precision=jax.lax.Precision.HIGHEST)
    conv = conv + bias[None, :, None, None]
    N, C, H, W = conv.shape
    out = conv.reshape(N, num_conv_units, caps_dim, H, W)
    out = out.transpose(0, 1, 3, 4, 2).reshape(N, -1, caps_dim)
    sq = jnp.sum(out ** 2, axis=-1, keepdims=True)
    scale = sq / (1.0 + sq)
    return scale * out / (jnp.sqrt(sq) + 1e-8)


# --------------------------------- Main ------------------------------------
if __name__ == "__main__":
    # small shapes consistent with the module's forward
    N, C_in, H, W = 2, 4, 16, 16
    num_conv_units, caps_dim = 4, 8
    kernel_size, stride = 9, 2
    C_out = num_conv_units * caps_dim

    key = jax.random.PRNGKey(0)
    kx, kw, kb = jax.random.split(key, 3)
    x = jax.random.normal(kx, (N, C_in, H, W), dtype=jnp.float32)
    # deterministic synthetic conv parameters (Conv2d(in=C_in, out=C_out, k=9, s=2))
    weight = jax.random.normal(kw, (C_out, C_in, kernel_size, kernel_size),
                               dtype=jnp.float32) * 0.05
    bias = jax.random.normal(kb, (C_out,), dtype=jnp.float32) * 0.05

    fwd = jax.jit(functools.partial(
        primary_caps_forward,
        num_conv_units=num_conv_units, caps_dim=caps_dim,
        kernel_size=kernel_size, stride=stride))

    out = jax.block_until_ready(fwd(x, weight, bias))

    # Accuracy contract: the kernel quantizes x / weight to bf16 (f32 MXU
    # accumulation), so the primary check compares against an f32 reference
    # fed the same bf16-rounded inputs.
    ref_bf16_inputs = jax.block_until_ready(primary_caps_reference(
        x, weight, bias,
        num_conv_units=num_conv_units, caps_dim=caps_dim,
        kernel_size=kernel_size, stride=stride,
        compute_dtype=jnp.bfloat16))
    np.testing.assert_allclose(np.asarray(out), np.asarray(ref_bf16_inputs),
                               rtol=2e-2, atol=1e-4)

    # Loose sanity bound against the full-f32 module (bf16-level tolerance).
    ref_f32 = jax.block_until_ready(primary_caps_reference(
        x, weight, bias,
        num_conv_units=num_conv_units, caps_dim=caps_dim,
        kernel_size=kernel_size, stride=stride))
    np.testing.assert_allclose(np.asarray(out), np.asarray(ref_f32),
                               rtol=5e-2, atol=1e-2)

    print("KERNEL_OK")
</pallas_src>

<mosaic_0001>
module attributes {stable_mosaic.version = 11 : i64} {
  func.func @primary_caps_kernel(%arg0: i32, %arg1: i32, %arg2: memref<32x384xbf16, #tpu.memory_space<vmem>>, %arg3: memref<384x128xbf16, #tpu.memory_space<vmem>>, %arg4: memref<1x128xf32, #tpu.memory_space<vmem>>, %arg5: memref<128x128xbf16, #tpu.memory_space<vmem>>, %arg6: memref<32x128xf32, #tpu.memory_space<vmem>>) attributes {dimension_semantics = [#tpu.dimension_semantics<parallel>, #tpu.dimension_semantics<arbitrary>], iteration_bounds = array<i64: 1, 1>, scalar_prefetch = 0 : i64, scratch_operands = 0 : i64, tpu.core_type = #tpu.core_type<tc>, window_params = [{transform_indices = @transform_0, window_bounds = array<i64: 32, 384>}, {pipeline_mode = #tpu.pipeline_mode<synchronous>, transform_indices = @transform_1, window_bounds = array<i64: 384, 128>}, {pipeline_mode = #tpu.pipeline_mode<synchronous>, transform_indices = @transform_2, window_bounds = array<i64: 1, 128>}, {pipeline_mode = #tpu.pipeline_mode<synchronous>, transform_indices = @transform_3, window_bounds = array<i64: 128, 128>}, {transform_indices = @transform_4, window_bounds = array<i64: 32, 128>}]} {
    %c0_i32 = arith.constant 0 : i32
    %0 = arith.cmpi eq, %arg1, %c0_i32 : i32
    %1 = arith.extui %0 : i1 to i32
    %c0_i32_0 = arith.constant 0 : i32
    %2 = arith.cmpi ne, %1, %c0_i32_0 : i32
    scf.if %2 {
      %cst_9 = arith.constant 0.000000e+00 : f32
      %15 = vector.broadcast %cst_9 : f32 to vector<32x128xf32>
      %c0_10 = arith.constant 0 : index
      %c0_11 = arith.constant 0 : index
      %16 = vector.load %arg6[%c0_10, %c0_11] : memref<32x128xf32, #tpu.memory_space<vmem>>, vector<32x128xf32>
      tpu.vector_store %arg6[%c0_10, %c0_11], %15 {strides = array<i32>} : memref<32x128xf32, #tpu.memory_space<vmem>>, vector<32x128xf32>,
    } else {
    }
    %c384_i32 = arith.constant 384 : i32
    %3 = arith.muli %arg1, %c384_i32 : i32
    %4 = tpu.assume_multiple %3, 128 : i32
    %c0 = arith.constant 0 : index
    %c0_1 = arith.constant 0 : index
    %5 = vector.load %arg6[%c0, %c0_1] : memref<32x128xf32, #tpu.memory_space<vmem>>, vector<32x128xf32>
    %c0_2 = arith.constant 0 : index
    %c0_3 = arith.constant 0 : index
    %6 = vector.load %arg2[%c0_2, %c0_3] : memref<32x384xbf16, #tpu.memory_space<vmem>>, vector<32x384xbf16>
    %7 = arith.index_cast %4 : i32 to index
    %c0_4 = arith.constant 0 : index
    %8 = vector.load %arg3[%7, %c0_4] : memref<384x128xbf16, #tpu.memory_space<vmem>>, vector<384x128xbf16>
    %cst = arith.constant dense<0.000000e+00> : vector<32x128xf32>
    %9 = tpu.matmul %6, %8, %cst {dimension_numbers = #tpu.dot_dimension_numbers<[1], [0], [0], [1], [0, 0, 1, 1], [], []>} : vector<32x384xbf16>, vector<384x128xbf16>, vector<32x128xf32> -> vector<32x128xf32>
    %10 = arith.addf %5, %9 : vector<32x128xf32>
    %c0_5 = arith.constant 0 : index
    %c0_6 = arith.constant 0 : index
    %11 = vector.load %arg6[%c0_5, %c0_6] : memref<32x128xf32, #tpu.memory_space<vmem>>, vector<32x128xf32>
    tpu.vector_store %arg6[%c0_5, %c0_6], %10 {strides = array<i32>} : memref<32x128xf32, #tpu.memory_space<vmem>>, vector<32x128xf32>,
    %c0_i32_7 = arith.constant 0 : i32
    %12 = arith.cmpi eq, %arg1, %c0_i32_7 : i32
    %13 = arith.extui %12 : i1 to i32
    %c0_i32_8 = arith.constant 0 : i32
    %14 = arith.cmpi ne, %13, %c0_i32_8 : i32
    scf.if %14 {
      %c0_9 = arith.constant 0 : index
      %c0_10 = arith.constant 0 : index
      %15 = vector.load %arg6[%c0_9, %c0_10] : memref<32x128xf32, #tpu.memory_space<vmem>>, vector<32x128xf32>
      %c0_11 = arith.constant 0 : index
      %c0_12 = arith.constant 0 : index
      %16 = vector.load %arg4[%c0_11, %c0_12] : memref<1x128xf32, #tpu.memory_space<vmem>>, vector<1x128xf32>
      %17 = vector.broadcast %16 : vector<1x128xf32> to vector<32x128xf32>
      %18 = arith.addf %15, %17 : vector<32x128xf32>
      %19 = arith.mulf %18, %18 : vector<32x128xf32>
      %20 = arith.truncf %19 : vector<32x128xf32> to vector<32x128xbf16>
      %c0_13 = arith.constant 0 : index
      %c0_14 = arith.constant 0 : index
      %21 = vector.load %arg5[%c0_13, %c0_14] : memref<128x128xbf16, #tpu.memory_space<vmem>>, vector<128x128xbf16>
      %cst_15 = arith.constant dense<0.000000e+00> : vector<32x128xf32>
      %22 = tpu.matmul %20, %21, %cst_15 {dimension_numbers = #tpu.dot_dimension_numbers<[1], [0], [0], [1], [0, 0, 1, 1], [], []>} : vector<32x128xbf16>, vector<128x128xbf16>, vector<32x128xf32> -> vector<32x128xf32>
      %cst_16 = arith.constant 1.000000e+00 : f32
      %23 = vector.broadcast %cst_16 : f32 to vector<32x128xf32>
      %24 = arith.addf %23, %22 : vector<32x128xf32>
      %25 = math.sqrt %22 : vector<32x128xf32>
      %cst_17 = arith.constant 9.99999993E-9 : f32
      %26 = vector.broadcast %cst_17 : f32 to vector<32x128xf32>
      %27 = arith.addf %25, %26 : vector<32x128xf32>
      %28 = arith.mulf %24, %27 : vector<32x128xf32>
      %29 = tpu.reciprocal %28 : vector<32x128xf32> -> vector<32x128xf32>
      %30 = arith.mulf %18, %22 : vector<32x128xf32>
      %31 = arith.mulf %30, %29 : vector<32x128xf32>
      %c0_18 = arith.constant 0 : index
      %c0_19 = arith.constant 0 : index
      %32 = vector.load %arg6[%c0_18, %c0_19] : memref<32x128xf32, #tpu.memory_space<vmem>>, vector<32x128xf32>
      tpu.vector_store %arg6[%c0_18, %c0_19], %31 {strides = array<i32>} : memref<32x128xf32, #tpu.memory_space<vmem>>, vector<32x128xf32>,
    } else {
    }
    return
  }
  func.func @transform_0(%arg0: i32, %arg1: i32) -> (i32, i32) {
    %c0_i32 = arith.constant 0 : i32
    return %arg0, %arg1 : i32, i32
  }
  func.func @transform_1(%arg0: i32, %arg1: i32) -> (i32, i32) {
    %c0_i32 = arith.constant 0 : i32
    %c0_i32_0 = arith.constant 0 : i32
    %c0_i32_1 = arith.constant 0 : i32
    return %c0_i32, %c0_i32_0 : i32, i32
  }
  func.func @transform_2(%arg0: i32, %arg1: i32) -> (i32, i32) {
    %c0_i32 = arith.constant 0 : i32
    %c0_i32_0 = arith.constant 0 : i32
    %c0_i32_1 = arith.constant 0 : i32
    return %c0_i32, %c0_i32_0 : i32, i32
  }
  func.func @transform_3(%arg0: i32, %arg1: i32) -> (i32, i32) {
    %c0_i32 = arith.constant 0 : i32
    %c0_i32_0 = arith.constant 0 : i32
    %c0_i32_1 = arith.constant 0 : i32
    return %c0_i32, %c0_i32_0 : i32, i32
  }
  func.func @transform_4(%arg0: i32, %arg1: i32) -> (i32, i32) {
    %c0_i32 = arith.constant 0 : i32
    %c0_i32_0 = arith.constant 0 : i32
    return %arg0, %c0_i32 : i32, i32
  }
}

</mosaic_0001>

<bundles_post_ra>
// kernel: primary_caps_forward.1
= control target key start
LH: loop header
LB: loop body
LE: loop exit
PB: predicated region body
PF: predicated region fallthrough
CT: control target
= control target key end

     0   :  { %s925_s1 = inlined_call_operand.vmem [shape: bf16[384,128], index: 1, kind: input, shape index: {}]   ;;  %s926_s0 = inlined_call_operand.vmem [shape: bf16[32,384], index: 0, kind: input, shape index: {}]   ;;  %s927_s3 = inlined_call_operand.vmem [shape: bf16[128,128], index: 3, kind: input, shape index: {}]   ;;  %s928_s2 = inlined_call_operand.vmem [shape: f32[1,128], index: 2, kind: input, shape index: {}]   ;;  %s929_s4 = inlined_call_operand.vmem [shape: f32[32,128], index: 4, kind: output, shape index: {}]  }
   0x1   :  { %v700_v0 = vld [vmem:[%s925_s1 + $0x40] sm:$0xff]   ;;  %v703_v3 = vld [vmem:[%s925_s1 + $0x48] sm:$0xff]   ;;  %v706_v6 = vld [vmem:[%s925_s1 + $0x50] sm:$0xff]  }
   0x2   :  { %v701_v1 = vld [vmem:[%s925_s1] sm:$0xff]   ;;  %611 = vmatprep.subr.bf16.mxu0 %v700_v0  ;;  %v704_v4 = vld [vmem:[%s925_s1 + $0x8] sm:$0xff]   ;;  %v707_v7 = vld [vmem:[%s925_s1 + $0x10] sm:$0xff]  }
   0x3   :  { %v702_v2 = vld [vmem:[%s925_s1 + $0x80] sm:$0xff]   ;;  %612 = vmatpush3.bf16.msra.mxu0 %v701_v1  ;;  %v705_v5 = vld [vmem:[%s925_s1 + $0x88] sm:$0xff]   ;;  %v708_v8 = vld [vmem:[%s925_s1 + $0x90] sm:$0xff]  }
   0x4   :  { %659 = vmatprep.subr.bf16.mxu1 %v702_v2  ;;  %613 = vmatprep.subr.bf16.mxu0 %v703_v3  ;;  %v709_v9 = vld [vmem:[%s925_s1 + $0x58] sm:$0xff]   ;;  %v712_v12 = vld [vmem:[%s925_s1 + $0x60] sm:$0xff]   ;;  %v715_v15 = vld [vmem:[%s925_s1 + $0x68] sm:$0xff]  }
   0x5   :  { %660 = vmatpush3.bf16.msra.mxu1 %v702_v2  ;;  %v710_v10 = vld [vmem:[%s925_s1 + $0x18] sm:$0xff]   ;;  %v714_v13 = vld [vmem:[%s925_s1 + $0xa0] sm:$0xff]   ;;  %v717_v16 = vld [vmem:[%s925_s1 + $0xa8] sm:$0xff]  }
   0x6   :  { %661 = vmatprep.subr.bf16.mxu1 %v705_v5  ;;  %v711_v11 = vld [vmem:[%s925_s1 + $0x98] sm:$0xff]   ;;  %v713_v14 = vld [vmem:[%s925_s1 + $0x20] sm:$0xff]   ;;  %v716_v17 = vld [vmem:[%s925_s1 + $0x28] sm:$0xff]  }
   0x7   :  { %614 = vmatpush3.bf16.msra.mxu0 %v704_v4  ;;  %v718_v18 = vld [vmem:[%s925_s1 + $0x70] sm:$0xff]   ;;  %v721_v21 = vld [vmem:[%s925_s1 + $0x78] sm:$0xff]   ;;  %v724_v26 = vld [vmem:[%s926_s0] ss:$12 sps:$4 sm:$0xff]  }
   0x8   :  { %615 = vmatprep.subr.bf16.mxu0 %v706_v6  ;;  %v719_v19 = vld [vmem:[%s925_s1 + $0x30] sm:$0xff]   ;;  %v723_v22 = vld [vmem:[%s925_s1 + $0xb8] sm:$0xff]   ;;  %v728_v28 = vld [vmem:[%s926_s0 + $0x20] ss:$12 sps:$4 sm:$0xff]  }
   0x9   :  { %662 = vmatpush3.bf16.msra.mxu1 %v705_v5  ;;  %v720_v20 = vld [vmem:[%s925_s1 + $0xb0] sm:$0xff]   ;;  %v722_v25 = vld [vmem:[%s925_s1 + $0x38] sm:$0xff]   ;;  %v732_v30 = vld [vmem:[%s927_s3] sm:$0xff]  }
   0xa   :  { %663 = vmatprep.subr.bf16.mxu1 %v708_v8  ;;  %v726_v23 = vld [vmem:[%s926_s0 + $0x4] ss:$12 sps:$4 sm:$0xff]   ;;  %v727_v24 = vld [vmem:[%s926_s0 + $0x8] ss:$12 sps:$4 sm:$0xff]   ;;  %v735_v33 = vld [vmem:[%s927_s3 + $0x18] sm:$0xff]  }
   0xb   :  { %616 = vmatpush3.bf16.msra.mxu0 %v707_v7  ;;  %299 = vmatprep.mubr.bf16.mxu0 %v726_v23  ;;  %v729_v27 = vld [vmem:[%s926_s0 + $0x1c] ss:$12 sps:$4 sm:$0xff]   ;;  %v731_v29 = vld [vmem:[%s926_s0 + $0x18] ss:$12 sps:$4 sm:$0xff]   ;;  %v734_v32 = vld [vmem:[%s927_s3 + $0x10] sm:$0xff]  }
   0xc   :  { %617 = vmatprep.subr.bf16.mxu0 %v709_v9  ;;  %675 = vmatprep.mubr.bf16.mxu1 %v727_v24  ;;  %v733_v31 = vld [vmem:[%s927_s3 + $0x8] sm:$0xff]   ;;  %v736_v34 = vld [vmem:[%s927_s3 + $0x20] sm:$0xff]   ;;  %v738_v36 = vld [vmem:[%s927_s3 + $0x30] sm:$0xff]  }
   0xd   :  { %664 = vmatpush3.bf16.msra.mxu1 %v708_v8  ;;  %v737_v35 = vld [vmem:[%s927_s3 + $0x28] sm:$0xff]   ;;  %v739_v37 = vld [vmem:[%s927_s3 + $0x38] sm:$0xff]   ;;  %v602_v49 = vld [vmem:[%s928_s2] ss:$0 sm:$0xff] }
   0xe   :  { %665 = vmatprep.subr.bf16.mxu1 %v711_v11 }
   0xf   :  { %618 = vmatpush3.bf16.msra.mxu0 %v710_v10 }
  0x10   :  { %619 = vmatprep.subr.bf16.mxu0 %v712_v12 }
  0x11   :  { %666 = vmatpush3.bf16.msra.mxu1 %v711_v11 }
  0x12   :  { %667 = vmatprep.subr.bf16.mxu1 %v714_v13 }
  0x13   :  { %620 = vmatpush3.bf16.msra.mxu0 %v713_v14 }
  0x14   :  { %621 = vmatprep.subr.bf16.mxu0 %v715_v15 }
  0x15   :  { %668 = vmatpush3.bf16.msra.mxu1 %v714_v13 }
  0x16   :  { %669 = vmatprep.subr.bf16.mxu1 %v717_v16 }
  0x17   :  { %622 = vmatpush3.bf16.msra.mxu0 %v716_v17 }
  0x18   :  { %623 = vmatprep.subr.bf16.mxu0 %v718_v18 }
  0x19   :  { %670 = vmatpush3.bf16.msra.mxu1 %v717_v16 }
  0x1a   :  { %671 = vmatprep.subr.bf16.mxu1 %v720_v20 }
  0x1b   :  { %624 = vmatpush3.bf16.msra.mxu0 %v719_v19 }
  0x1c   :  { %625 = vmatprep.subr.bf16.mxu0 %v721_v21 }
  0x1d   :  { %672 = vmatpush3.bf16.msra.mxu1 %v720_v20 }
  0x1e   :  { %673 = vmatprep.subr.bf16.mxu1 %v723_v22 }
  0x1f   :  { %626 = vmatpush3.bf16.msra.mxu0 %v722_v25 }
  0x20   :  { %679 = vmatprep.subr.bf16.mxu0 %v732_v30 }
  0x21   :  { %674 = vmatpush3.bf16.msra.mxu1 %v723_v22 }
  0x22   :  { %300 = vmatmul.mubr.bf16.vlgmr.msra.gmra.mrb[0].mxu0 %v724_v26 }
  0x23   :  { %307 = vmatprep.mubr.bf16.mxu0 %v729_v27  ;;  %680 = vmatpush3.bf16.msra.mxu0 %v732_v30 }
  0x24   :  { %676 = vmatmul.mubr.bf16.vlgmr.msra.gmra.mrb[0].mxu1 %v728_v28  ;;  %681 = vmatprep.subr.bf16.mxu0 %v733_v31 }
  0x27   :  { %682 = vmatpush3.bf16.msra.mxu0 %v733_v31 }
  0x28   :  { %683 = vmatprep.subr.bf16.mxu0 %v734_v32 }
  0x2a   :  { %308 = vmatmul.mubr.bf16.gmra.mrb[4].mxu0 %v731_v29 }
  0x2b   :  { %684 = vmatpush3.bf16.msra.mxu0 %v734_v32 }
  0x2c   :  { %685 = vmatprep.subr.bf16.mxu0 %v735_v33 }
  0x2f   :  { %686 = vmatpush3.bf16.msra.mxu0 %v735_v33 }
  0x30   :  { %687 = vmatprep.subr.bf16.mxu0 %v736_v34 }
  0x33   :  { %688 = vmatpush3.bf16.msra.mxu0 %v736_v34 }
  0x34   :  { %689 = vmatprep.subr.bf16.mxu0 %v737_v35 }
  0x37   :  { %690 = vmatpush3.bf16.msra.mxu0 %v737_v35 }
  0x38   :  { %691 = vmatprep.subr.bf16.mxu0 %v738_v36 }
  0x3b   :  { %692 = vmatpush3.bf16.msra.mxu0 %v738_v36 }
  0x3c   :  { %693 = vmatprep.subr.bf16.mxu0 %v739_v37 }
  0x3f   :  { %694 = vmatpush3.bf16.msra.mxu0 %v739_v37 }
  0xf5   :  { %v627_v38 = vpop.f32.mrb[0].mxu0 }
  0xf6   :  { %v628_v39 = vpop.f32.mrb[1].mxu0 }
  0xf7   :  { %v629_v40 = vadd.f32 %v628_v39, %v627_v38  ;;  %v630_v41 = vpop.f32.mrb[2].mxu0  ;;  %v677_v42 = vpop.f32.mrb[0].mxu1 }
  0xf8   :  { %v631_v43 = vpop.f32.mrb[3].mxu0  ;;  %v350_v44 = vpop.f32.mrb[1].mxu1 }
  0xf9   :  { %v632_v45 = vadd.f32 %v631_v43, %v630_v41  ;;  %v351_v46 = vadd.f32 %v629_v40, %v350_v44  ;;  %v678_v47 = vpop.f32.mrb[2].mxu1 }
  0xfa   :  { %v353_v48 = vpop.f32.mrb[3].mxu1 }
  0xfb   :  { %v354_v50 = vadd.f32 %v632_v45, %v353_v48  ;;  %v898_v52 = vadd.f32 %v602_v49, %v351_v46 }
  0xfd   :  { %v633_v51 = vpop.f32.mrb[4].mxu0  ;;  %v900_v56 = vadd.f32 %v602_v49, %v354_v50  ;;  %v391_v60 = vmul.f32 %v898_v52, %v898_v52 }
  0xfe   :  { %v634_v53 = vpop.f32.mrb[5].mxu0 }
  0xff   :  { %v635_v54 = vadd.f32 %v634_v53, %v633_v51  ;;  %v636_v55 = vpop.f32.mrb[6].mxu0  ;;  %v392_v61 = vmul.f32 %v900_v56, %v900_v56 }
 0x100   :  { %v637_v57 = vpop.f32.mrb[7].mxu0 }
 0x101   :  { %v359_v58 = vadd.f32 %v677_v42, %v635_v54  ;;  %v638_v59 = vadd.f32 %v637_v57, %v636_v55  ;;  %v395_v63 = vpack.c.bf16 %v392_v61, %v391_v60 }
 0x103   :  { %v362_v62 = vadd.f32 %v678_v47, %v638_v59  ;;  %695 = vmatprep.mubr.bf16.mxu0 %v395_v63  ;;  %v389_v0 = vadd.f32 %v602_v49, %v359_v58 }
 0x105   :  { %v906_v1 = vadd.f32 %v602_v49, %v362_v62  ;;  %v393_v2 = vmul.f32 %v389_v0, %v389_v0 }
 0x107   :  { %v394_v3 = vmul.f32 %v906_v1, %v906_v1 }
 0x109   :  { %v396_v4 = vpack.c.bf16 %v394_v3, %v393_v2 }
 0x10b   :  { %696 = vmatmul.mubr.bf16.vlgmr.msra.gmra.mrb[8].mxu0 %v396_v4 }
 0x1de   :  { %v697_v5 = vpop.f32.mrb[8].mxu0 }
 0x1df   :  { %740 = vrsqrt.f32 %v697_v5  ;;  %v495_v6 = vpop.f32.mrb[9].mxu0  ;;  %v512_v11 = vadd.f32 1.0, %v697_v5  ;;  %vm530_vm0 = vcmp.eq.f32.partialorder %v697_v5, inf  ;;  %vm532_vm1 = vcmp.eq.f32.partialorder %v697_v5, 0.0 }
 0x1e0   :  { %742 = vrsqrt.f32 %v495_v6  ;;  %v698_v7 = vpop.f32.mrb[10].mxu0  ;;  %v533_v13 = vand.u32 2147483648, %v697_v5  ;;  %v510_v14 = vadd.f32 1.0, %v495_v6  ;;  %vm516_vm2 = vcmp.eq.f32.partialorder %v495_v6, inf }
 0x1e1   :  { %v498_v8 = vpop.f32.mrb[11].mxu0  ;;  %744 = vrsqrt.f32 %v698_v7  ;;  %vm518_vm3 = vcmp.eq.f32.partialorder %v495_v6, 0.0  ;;  %v519_v18 = vand.u32 2147483648, %v495_v6  ;;  %vm537_vm4 = vcmp.eq.f32.partialorder %v698_v7, inf }
 0x1e2   :  { %746 = vrsqrt.f32 %v498_v8  ;;  %vm539_vm5 = vcmp.eq.f32.partialorder %v698_v7, 0.0  ;;  %v540_v25 = vand.u32 2147483648, %v698_v7  ;;  %vm523_vm6 = vcmp.eq.f32.partialorder %v498_v8, inf }
 0x1e3   :  { %v526_v29 = vand.u32 2147483648, %v498_v8  ;;  %vm525_vm7 = vcmp.eq.f32.partialorder %v498_v8, 0.0  ;;  %v513_v34 = vadd.f32 1.0, %v698_v7  ;;  %v511_v37 = vadd.f32 1.0, %v498_v8 }
 0x1e4   :  { %v556_v41 = vmul.f32 %v697_v5, %v389_v0  ;;  %v554_v43 = vmul.f32 %v495_v6, %v898_v52  ;;  %v557_v47 = vmul.f32 %v698_v7, %v906_v1  ;;  %v555_v49 = vmul.f32 %v498_v8, %v900_v56 }
 0x1e9   :  { %v741_v9 = vpop.eup %740 }
 0x1ea   :  { %v743_v10 = vpop.eup %742  ;;  %v529_v12 = vmul.f32 %v741_v9, %v697_v5 }
 0x1eb   :  { %v515_v15 = vmul.f32 %v743_v10, %v495_v6  ;;  %v745_v16 = vpop.eup %744 }
 0x1ec   :  { %v531_v17 = vsel %vm530_vm0, %v697_v5, %v529_v12  ;;  %v747_v19 = vpop.eup %746  ;;  %v536_v22 = vmul.f32 %v745_v16, %v698_v7 }
 0x1ed   :  { %v534_v20 = vsel %vm532_vm1, %v533_v13, %v531_v17  ;;  %v517_v21 = vsel %vm516_vm2, %v495_v6, %v515_v15  ;;  %v522_v26 = vmul.f32 %v747_v19, %v498_v8 }
 0x1ee   :  { %v544_v23 = vadd.f32 1e-08, %v534_v20  ;;  %v520_v24 = vsel %vm518_vm3, %v519_v18, %v517_v21  ;;  %v538_v28 = vsel %vm537_vm4, %v698_v7, %v536_v22 }
 0x1ef   :  { %v542_v27 = vadd.f32 1e-08, %v520_v24  ;;  %v541_v31 = vsel %vm539_vm5, %v540_v25, %v538_v28  ;;  %v524_v32 = vsel %vm523_vm6, %v498_v8, %v522_v26 }
 0x1f0   :  { %v548_v30 = vmul.f32 %v544_v23, %v512_v11  ;;  %v545_v35 = vadd.f32 1e-08, %v541_v31  ;;  %v527_v36 = vsel %vm525_vm7, %v526_v29, %v524_v32 }
 0x1f1   :  { %v546_v33 = vmul.f32 %v542_v27, %v510_v14  ;;  %v543_v38 = vadd.f32 1e-08, %v527_v36 }
 0x1f2   :  { %748 = vrcp.f32 %v548_v30  ;;  %v549_v39 = vmul.f32 %v545_v35, %v513_v34 }
 0x1f3   :  { %750 = vrcp.f32 %v546_v33  ;;  %v547_v40 = vmul.f32 %v543_v38, %v511_v37 }
 0x1f4   :  { %752 = vrcp.f32 %v549_v39 }
 0x1f5   :  { %754 = vrcp.f32 %v547_v40 }
 0x1fc   :  { %v749_v42 = vpop.eup %748 }
 0x1fd   :  { %v751_v44 = vpop.eup %750  ;;  %v560_v45 = vmul.f32 %v749_v42, %v556_v41 }
 0x1fe   :  { %v558_v46 = vmul.f32 %v751_v44, %v554_v43  ;;  %v753_v48 = vpop.eup %752 }
 0x1ff   :  { %564 = vst [vmem:[%s929_s4 + $0x10] sm:$0xff] %v560_v45  ;;  %v755_v50 = vpop.eup %754  ;;  %v561_v51 = vmul.f32 %v753_v48, %v557_v47 }
 0x200   :  { %562 = vst [vmem:[%s929_s4] sm:$0xff] %v558_v46  ;;  %v559_v53 = vmul.f32 %v755_v50, %v555_v49 }
 0x201   :  { %565 = vst [vmem:[%s929_s4 + $0x18] sm:$0xff] %v561_v51 }
 0x202   :  { %563 = vst [vmem:[%s929_s4 + $0x8] sm:$0xff] %v559_v53 }

</bundles_post_ra>
